<compile_context>
chip_gen: v6e
topology: v6e:2x2x1
jax: 0.10.0
libtpu: 0.0.40
codegen_flags: <defaults>
</compile_context>

<pallas_src>
import jax
import jax.numpy as jnp
from jax.experimental import pallas as pl
from jax.experimental.pallas import tpu as pltpu


def _round_up(n, m):
    return ((n + m - 1) // m) * m


def _mlp_kernel(x_ref, w1_ref, b1_ref, w2_ref, b2_ref, o_ref, h_ref):
    # One grid step = one batch tile. All weights/biases are VMEM-resident
    # (invariant Buffered(1) blocks), so the only per-step HBM traffic is the
    # x tile in and the output tile out.
    mm_dtype = w1_ref.dtype
    x = x_ref[...].astype(mm_dtype)                       # cast in-kernel (no wrapper op)
    h = jnp.dot(x, w1_ref[...], preferred_element_type=jnp.float32)
    h = jnp.maximum(h + b1_ref[...], 0.0)                 # bias + ReLU on f32 accumulator
    h_ref[...] = h.astype(h_ref.dtype)                    # bf16 hidden acts for 2nd MXU pass
    out = jnp.dot(h_ref[...], w2_ref[...], preferred_element_type=jnp.float32)
    o_ref[...] = (out + b2_ref[...]).astype(o_ref.dtype)  # fused bias add + cast + store


def prepare_z_module_params(w1, b1, w2, b2, matmul_dtype=jnp.bfloat16):
    """Cast weights to the MXU dtype ONCE (not on every forward call)."""
    return (w1.astype(matmul_dtype),
            b1.reshape(1, -1).astype(jnp.float32),
            w2.astype(matmul_dtype),
            b2.reshape(1, -1).astype(jnp.float32))


def z_module_forward(x, w1c, b1_2d, w2c, b2_2d, *, tile_b=256, out_dtype=None):
    """x: (B, D_in); (w1c, b1_2d, w2c, b2_2d) from prepare_z_module_params."""
    B, D_in = x.shape
    H = w1c.shape[1]
    D_out = w2c.shape[1]
    out_dtype = x.dtype if out_dtype is None else out_dtype

    # Batch tiling: multiples of 16 (bf16 sublane packing). For small/medium B,
    # clamp so at least 2 batch tiles exist -> both v7x TensorCores get work.
    cap = _round_up(B, 16)
    if B >= 32:
        cap = min(cap, _round_up(-(-B // 2), 16))
    tile_b = max(16, min(tile_b, cap))
    B_pad = _round_up(B, tile_b)
    if B_pad != B:
        x = jnp.pad(x, ((0, B_pad - B), (0, 0)))

    grid = (B_pad // tile_b,)

    flops = 2 * B_pad * (D_in * H + H * D_out)
    bytes_accessed = (
        B_pad * D_in * x.dtype.itemsize            # x read once
        + w1c.size * w1c.dtype.itemsize            # W1 resident, fetched once
        + w2c.size * w2c.dtype.itemsize            # W2 resident, fetched once
        + b1_2d.size * 4 + b2_2d.size * 4
        + B_pad * D_out * jnp.dtype(out_dtype).itemsize
    )

    out = pl.pallas_call(
        _mlp_kernel,
        out_shape=jax.ShapeDtypeStruct((B_pad, D_out), out_dtype),
        grid_spec=pltpu.PrefetchScalarGridSpec(
            num_scalar_prefetch=0,
            grid=grid,
            in_specs=[
                # x tile: streamed per batch tile (double-buffered by default)
                pl.BlockSpec((tile_b, D_in), lambda i: (i, 0)),
                # weights / biases: grid-invariant, single-buffered -> VMEM-resident
                pl.BlockSpec((D_in, H), lambda i: (0, 0),
                             pipeline_mode=pl.Buffered(1)),
                pl.BlockSpec((1, H), lambda i: (0, 0),
                             pipeline_mode=pl.Buffered(1)),
                pl.BlockSpec((H, D_out), lambda i: (0, 0),
                             pipeline_mode=pl.Buffered(1)),
                pl.BlockSpec((1, D_out), lambda i: (0, 0),
                             pipeline_mode=pl.Buffered(1)),
            ],
            out_specs=pl.BlockSpec((tile_b, D_out), lambda i: (i, 0)),
            scratch_shapes=[pltpu.VMEM((tile_b, H), w1c.dtype)],  # bf16 hidden acts
        ),
        compiler_params=pltpu.CompilerParams(
            # batch tiles are independent -> megacore sharding on v7x
            dimension_semantics=("parallel",),
            vmem_limit_bytes=48 * 1024 * 1024,
        ),
        cost_estimate=pl.CostEstimate(
            flops=flops, transcendentals=0, bytes_accessed=bytes_accessed),
    )(x, w1c, b1_2d, w2c, b2_2d)

    return out[:B] if B_pad != B else out


def init_linear_params(key, d_in, d_out, dtype=jnp.float32):
    """PyTorch nn.Linear default init: U(-1/sqrt(fan_in), 1/sqrt(fan_in))."""
    k_w, k_b = jax.random.split(key)
    bound = 1.0 / (d_in ** 0.5)
    w = jax.random.uniform(k_w, (d_in, d_out), dtype, minval=-bound, maxval=bound)
    b = jax.random.uniform(k_b, (d_out,), dtype, minval=-bound, maxval=bound)
    return w, b


if __name__ == "__main__":
    # Small shapes consistent with the module's MLP structure
    # (module defaults would be D_in=512, H=2048, D_out=4096; scaled down here).
    B, D_in, H, D_out = 8, 128, 256, 128

    key = jax.random.PRNGKey(0)
    k_x, k_l1, k_l2 = jax.random.split(key, 3)

    x = jax.random.normal(k_x, (B, D_in), jnp.float32)
    w1, b1 = init_linear_params(k_l1, D_in, H)
    w2, b2 = init_linear_params(k_l2, H, D_out)

    # One-time weight preparation (bf16 cast hoisted out of the forward path).
    params = prepare_z_module_params(w1, b1, w2, b2)

    out = z_module_forward(x, *params)
    out = jax.block_until_ready(out)

    # Reference in plain JAX, mimicking the kernel's bf16 matmul inputs with
    # f32 accumulation so tolerances stay tight.
    bf = jnp.bfloat16
    xb = x.astype(bf).astype(jnp.float32)
    w1b = w1.astype(bf).astype(jnp.float32)
    w2b = w2.astype(bf).astype(jnp.float32)
    h = jnp.maximum(xb @ w1b + b1, 0.0)
    hb = h.astype(bf).astype(jnp.float32)
    ref = hb @ w2b + b2

    assert out.shape == (B, D_out)
    assert jnp.allclose(out, ref, atol=1e-2, rtol=1e-2), "mismatch vs reference"

    print("KERNEL_OK")
</pallas_src>

<mosaic_0001>
module attributes {stable_mosaic.version = 11 : i64} {
  func.func @_mlp_kernel(%arg0: i32, %arg1: memref<16x128xf32, #tpu.memory_space<vmem>>, %arg2: memref<128x256xbf16, #tpu.memory_space<vmem>>, %arg3: memref<1x256xf32, #tpu.memory_space<vmem>>, %arg4: memref<256x128xbf16, #tpu.memory_space<vmem>>, %arg5: memref<1x128xf32, #tpu.memory_space<vmem>>, %arg6: memref<16x128xf32, #tpu.memory_space<vmem>>, %arg7: memref<16x256xbf16, #tpu.memory_space<vmem>>) attributes {dimension_semantics = [#tpu.dimension_semantics<parallel>], iteration_bounds = array<i64: 1>, scalar_prefetch = 0 : i64, scratch_operands = 1 : i64, tpu.core_type = #tpu.core_type<tc>, window_params = [{transform_indices = @transform_0, window_bounds = array<i64: 16, 128>}, {pipeline_mode = #tpu.pipeline_mode<synchronous>, transform_indices = @transform_1, window_bounds = array<i64: 128, 256>}, {pipeline_mode = #tpu.pipeline_mode<synchronous>, transform_indices = @transform_2, window_bounds = array<i64: 1, 256>}, {pipeline_mode = #tpu.pipeline_mode<synchronous>, transform_indices = @transform_3, window_bounds = array<i64: 256, 128>}, {pipeline_mode = #tpu.pipeline_mode<synchronous>, transform_indices = @transform_4, window_bounds = array<i64: 1, 128>}, {transform_indices = @transform_5, window_bounds = array<i64: 16, 128>}]} {
    %c0 = arith.constant 0 : index
    %c0_0 = arith.constant 0 : index
    %0 = vector.load %arg1[%c0, %c0_0] : memref<16x128xf32, #tpu.memory_space<vmem>>, vector<16x128xf32>
    %1 = arith.truncf %0 : vector<16x128xf32> to vector<16x128xbf16>
    %c0_1 = arith.constant 0 : index
    %c0_2 = arith.constant 0 : index
    %2 = vector.load %arg2[%c0_1, %c0_2] : memref<128x256xbf16, #tpu.memory_space<vmem>>, vector<128x256xbf16>
    %cst = arith.constant dense<0.000000e+00> : vector<16x256xf32>
    %3 = tpu.matmul %1, %2, %cst {dimension_numbers = #tpu.dot_dimension_numbers<[1], [0], [0], [1], [0, 0, 1, 1], [], []>} : vector<16x128xbf16>, vector<128x256xbf16>, vector<16x256xf32> -> vector<16x256xf32>
    %c0_3 = arith.constant 0 : index
    %c0_4 = arith.constant 0 : index
    %4 = vector.load %arg3[%c0_3, %c0_4] : memref<1x256xf32, #tpu.memory_space<vmem>>, vector<1x256xf32>
    %5 = vector.broadcast %4 : vector<1x256xf32> to vector<16x256xf32>
    %6 = arith.addf %3, %5 : vector<16x256xf32>
    %cst_5 = arith.constant 0.000000e+00 : f32
    %7 = vector.broadcast %cst_5 : f32 to vector<16x256xf32>
    %8 = arith.maximumf %6, %7 : vector<16x256xf32>
    %9 = arith.truncf %8 : vector<16x256xf32> to vector<16x256xbf16>
    %c0_6 = arith.constant 0 : index
    %c0_7 = arith.constant 0 : index
    %10 = vector.load %arg7[%c0_6, %c0_7] : memref<16x256xbf16, #tpu.memory_space<vmem>>, vector<16x256xbf16>
    tpu.vector_store %arg7[%c0_6, %c0_7], %9 {strides = array<i32>} : memref<16x256xbf16, #tpu.memory_space<vmem>>, vector<16x256xbf16>,
    %c0_8 = arith.constant 0 : index
    %c0_9 = arith.constant 0 : index
    %11 = vector.load %arg7[%c0_8, %c0_9] : memref<16x256xbf16, #tpu.memory_space<vmem>>, vector<16x256xbf16>
    %c0_10 = arith.constant 0 : index
    %c0_11 = arith.constant 0 : index
    %12 = vector.load %arg4[%c0_10, %c0_11] : memref<256x128xbf16, #tpu.memory_space<vmem>>, vector<256x128xbf16>
    %cst_12 = arith.constant dense<0.000000e+00> : vector<16x128xf32>
    %13 = tpu.matmul %11, %12, %cst_12 {dimension_numbers = #tpu.dot_dimension_numbers<[1], [0], [0], [1], [0, 0, 1, 1], [], []>} : vector<16x256xbf16>, vector<256x128xbf16>, vector<16x128xf32> -> vector<16x128xf32>
    %c0_13 = arith.constant 0 : index
    %c0_14 = arith.constant 0 : index
    %14 = vector.load %arg5[%c0_13, %c0_14] : memref<1x128xf32, #tpu.memory_space<vmem>>, vector<1x128xf32>
    %15 = vector.broadcast %14 : vector<1x128xf32> to vector<16x128xf32>
    %16 = arith.addf %13, %15 : vector<16x128xf32>
    %c0_15 = arith.constant 0 : index
    %c0_16 = arith.constant 0 : index
    %17 = vector.load %arg6[%c0_15, %c0_16] : memref<16x128xf32, #tpu.memory_space<vmem>>, vector<16x128xf32>
    tpu.vector_store %arg6[%c0_15, %c0_16], %16 {strides = array<i32>} : memref<16x128xf32, #tpu.memory_space<vmem>>, vector<16x128xf32>,
    return
  }
  func.func @transform_0(%arg0: i32) -> (i32, i32) {
    %c0_i32 = arith.constant 0 : i32
    %c0_i32_0 = arith.constant 0 : i32
    return %arg0, %c0_i32 : i32, i32
  }
  func.func @transform_1(%arg0: i32) -> (i32, i32) {
    %c0_i32 = arith.constant 0 : i32
    %c0_i32_0 = arith.constant 0 : i32
    %c0_i32_1 = arith.constant 0 : i32
    return %c0_i32, %c0_i32_0 : i32, i32
  }
  func.func @transform_2(%arg0: i32) -> (i32, i32) {
    %c0_i32 = arith.constant 0 : i32
    %c0_i32_0 = arith.constant 0 : i32
    %c0_i32_1 = arith.constant 0 : i32
    return %c0_i32, %c0_i32_0 : i32, i32
  }
  func.func @transform_3(%arg0: i32) -> (i32, i32) {
    %c0_i32 = arith.constant 0 : i32
    %c0_i32_0 = arith.constant 0 : i32
    %c0_i32_1 = arith.constant 0 : i32
    return %c0_i32, %c0_i32_0 : i32, i32
  }
  func.func @transform_4(%arg0: i32) -> (i32, i32) {
    %c0_i32 = arith.constant 0 : i32
    %c0_i32_0 = arith.constant 0 : i32
    %c0_i32_1 = arith.constant 0 : i32
    return %c0_i32, %c0_i32_0 : i32, i32
  }
  func.func @transform_5(%arg0: i32) -> (i32, i32) {
    %c0_i32 = arith.constant 0 : i32
    %c0_i32_0 = arith.constant 0 : i32
    return %arg0, %c0_i32 : i32, i32
  }
}

</mosaic_0001>

<bundles_post_ra>
// kernel: tpu_custom_call.1
= control target key start
LH: loop header
LB: loop body
LE: loop exit
PB: predicated region body
PF: predicated region fallthrough
CT: control target
= control target key end

     0   :  { %10 = vsyncpa [#allocation4], 0  ;;  %s707_s0 = inlined_call_operand.hbm [shape: f32[16,128], index: 0, kind: input, shape index: {}]   ;;  %s708_s1 = inlined_call_operand.hbm [shape: bf16[128,256], index: 1, kind: input, shape index: {}]   ;;  %s709_s2 = inlined_call_operand.vmem [shape: f32[1,256], index: 2, kind: input, shape index: {}]   ;;  %s710_s3 = inlined_call_operand.hbm [shape: bf16[256,128], index: 3, kind: input, shape index: {}]   ;;  %s711_s4 = inlined_call_operand.vmem [shape: f32[1,128], index: 4, kind: input, shape index: {}]   ;;  %s712_s5 = inlined_call_operand.hbm [shape: f32[16,128], index: 5, kind: output, shape index: {}]  }
   0x1   :  { %11 = vsyncpa [#allocation7], 0 }
   0x2   :  { %12 = vsyncpa [#allocation5], 0  ;;  %s641_s18 = smov [#allocation6]   ;;  %s642_s20 = smov [#allocation3]  }
   0x3   :  { %s30_s19 = sshll.u32 %s641_s18, 4  ;;  %s18_s21 = sshll.u32 %s642_s20, 4  ;;  %s31_s19 = int_to_ptr.vmem [resolvable:$true] %s30_s19  ;;  %s19_s21 = int_to_ptr.vmem [resolvable:$true] %s18_s21 }
   0x4   :  { %s563_s22 = scalar_lea.vmem %s31_s19, 2048  ;;  %p568_p1 = scmp.lt.s32.totalorder %s31_s19, %s31_s19 }
   0x5   :  { %p564_p0 = scmp.ne.s32.totalorder %s31_s19, %s563_s22  ;;  %p569_p2 = scmp.lt.s32.totalorder %s563_s22, %s563_s22 }
   0x7   :  { %p570_p3 = por %p569_p2, %p568_p1 }
   0x9   :  { %p571_p4 = pnand %p570_p3, %p564_p0 }
   0xb   :  { %574 = shalt.err (!%p571_p4)
}
   0xc   :  { %s643_s23 = smov 128   ;;  %s644_s24 = smov 8  }
   0xd   :  { %36 = dma.hbm_to_vmem [thread:$0]  %s708_s1, 2048, %s31_s19, [#allocation7], %s643_s23, %s643_s23, %s644_s24  }
   0xe   :  { %s583_s27 = scalar_lea.vmem %s19_s21, 256  ;;  %p588_p6 = scmp.lt.s32.totalorder %s19_s21, %s19_s21 }
   0xf   :  { %p584_p5 = scmp.ne.s32.totalorder %s19_s21, %s583_s27  ;;  %p589_p7 = scmp.lt.s32.totalorder %s583_s27, %s583_s27 }
  0x11   :  { %p590_p8 = por %p589_p7, %p588_p6 }
  0x13   :  { %p591_p9 = pnand %p590_p8, %p584_p5 }
  0x15   :  { %594 = shalt.err (!%p591_p9)
}
  0x16   :  { %24 = dma.hbm_to_vmem [thread:$0]  %s707_s0, 256, %s19_s21, [#allocation4], %s643_s23, %s643_s23, %s644_s24  }
  0x17   :  { %s645_s30 = smov [#allocation8]  }
  0x18   :  { %s44_s6 = sshll.u32 %s645_s30, 4  ;;  %s45_s6 = int_to_ptr.vmem [resolvable:$true] %s44_s6 }
  0x19   :  { %s603_s7 = scalar_lea.vmem %s45_s6, 2048  ;;  %p608_p11 = scmp.lt.s32.totalorder %s45_s6, %s45_s6 }
  0x1a   :  { %p604_p10 = scmp.ne.s32.totalorder %s45_s6, %s603_s7  ;;  %p609_p12 = scmp.lt.s32.totalorder %s603_s7, %s603_s7 }
  0x1c   :  { %p610_p13 = por %p609_p12, %p608_p11 }
  0x1e   :  { %p611_p0 = pnand %p610_p13, %p604_p10 }
  0x20   :  { %614 = shalt.err (!%p611_p0)
}
  0x21   :  { %s646_s1 = smov 64   ;;  %s647_s8 = smov 4  }
  0x22   :  { %50 = dma.hbm_to_vmem [thread:$0]  %s710_s3, 2048, %s45_s6, [#allocation7], %s646_s1, %s646_s1, %s647_s8  }
  0x23   :  { %635 = dma.done.wait [#allocation4], 256  }
  0x24   :  { %636 = vsyncadd [#allocation4], 4294967040 }
  0x25   :  { %637 = dma.done.wait [#allocation7], 4096  }
  0x26   :  { %638 = vsyncadd [#allocation7], 4294963200  ;;  %v648_v0 = vmov 0   ;;  %v515_v1 = vld [vmem:[#allocation6 + $0x74] ss:$8 sps:$4 sm:$0xff]   ;;  %v543_v16 = vld [vmem:[#allocation8 + $0x68] sm:$0xff]   ;;  %v84_v36 = vlaneseq }
  0x27   :  { %206 = vmatprep.mubr.bf16.mxu0 %v648_v0  ;;  %v517_v2 = vld [vmem:[#allocation6 + $0x70] ss:$8 sps:$4 sm:$0xff]   ;;  %174 = vmatprep.subr.bf16.mxu0 %v515_v1  ;;  %v518_v3 = vld [vmem:[#allocation6 + $0x64] ss:$8 sps:$4 sm:$0xff]   ;;  %v520_v4 = vld [vmem:[#allocation6 + $0x60] ss:$8 sps:$4 sm:$0xff]  }
  0x28   :  { %175 = vmatpush1.bf16.msra.mxu0 %v517_v2  ;;  %v521_v5 = vld [vmem:[#allocation6 + $0x54] ss:$8 sps:$4 sm:$0xff]   ;;  %v523_v6 = vld [vmem:[#allocation6 + $0x50] ss:$8 sps:$4 sm:$0xff]   ;;  %v524_v7 = vld [vmem:[#allocation6 + $0x44] ss:$8 sps:$4 sm:$0xff]  }
  0x29   :  { %176 = vmatprep.subr.bf16.mxu0 %v518_v3  ;;  %v526_v8 = vld [vmem:[#allocation6 + $0x40] ss:$8 sps:$4 sm:$0xff]   ;;  %v527_v9 = vld [vmem:[#allocation6 + $0x34] ss:$8 sps:$4 sm:$0xff]   ;;  %v529_v11 = vld [vmem:[#allocation6 + $0x30] ss:$8 sps:$4 sm:$0xff]  }
  0x2a   :  { %v539_v10 = vld [vmem:[#allocation8 + $0x78] sm:$0xff]   ;;  %v530_v13 = vld [vmem:[#allocation6 + $0x24] ss:$8 sps:$4 sm:$0xff]   ;;  %v541_v14 = vld [vmem:[#allocation8 + $0x70] sm:$0xff]   ;;  %v85_v37 = vshrl.u32 %v84_v36, 7  ;;  %s649_s12 = smov [#allocation9]  }
  0x2b   :  { %v540_v12 = vld [vmem:[#allocation8 + $0x38] sm:$0xff]   ;;  %484 = vmatprep.subr.bf16.mxu1 %v539_v10  ;;  %v542_v15 = vld [vmem:[#allocation8 + $0x30] sm:$0xff]   ;;  %v532_v17 = vld [vmem:[#allocation6 + $0x20] ss:$8 sps:$4 sm:$0xff]   ;;  %s430_s13 = sshll.u32 %s649_s12, 4  ;;  %s431_s13 = int_to_ptr.vmem [resolvable:$true] %s430_s13 }
  0x2c   :  { %177 = vmatpush1.bf16.msra.mxu0 %v520_v4  ;;  %485 = vmatpush3.bf16.msra.mxu1 %v540_v12  ;;  %v533_v18 = vld [vmem:[#allocation6 + $0x14] ss:$8 sps:$4 sm:$0xff]   ;;  %v544_v19 = vld [vmem:[#allocation8 + $0x28] sm:$0xff]   ;;  %v545_v20 = vld [vmem:[#allocation8 + $0x60] sm:$0xff]   ;;  %v90_v38 = vsub.s32 1, %v85_v37  ;;  %v86_v39 = vsub.s32 0, %v85_v37  ;;  %p620_p2 = scmp.lt.s32.totalorder %s431_s13, %s431_s13 }
  0x2d   :  { %178 = vmatprep.subr.bf16.mxu0 %v521_v5  ;;  %486 = vmatprep.subr.bf16.mxu1 %v541_v14  ;;  %v535_v21 = vld [vmem:[#allocation6 + $0x10] ss:$8 sps:$4 sm:$0xff]   ;;  %v546_v22 = vld [vmem:[#allocation8 + $0x20] sm:$0xff]   ;;  %v551_v32 = vld [vmem:[#allocation8 + $0x48] sm:$0xff]   ;;  %s615_s14 = scalar_lea.vmem %s431_s13, 256 }
  0x2e   :  { %v536_v23 = vld [vmem:[#allocation6 + $0x4] ss:$8 sps:$4 sm:$0xff]   ;;  %v547_v24 = vld [vmem:[#allocation8 + $0x58] sm:$0xff]   ;;  %v538_v25 = vld [vmem:[#allocation6] ss:$8 sps:$4 sm:$0xff]   ;;  %p616_p1 = scmp.ne.s32.totalorder %s431_s13, %s615_s14  ;;  %p621_p3 = scmp.lt.s32.totalorder %s615_s14, %s615_s14 }
  0x2f   :  { %v63_v26 = vld [vmem:[#allocation3] sm:$0xff]  ;;  %v64_v27 = vld [vmem:[#allocation3 + $0x8] sm:$0xff]  ;;  %v552_v33 = vld [vmem:[#allocation8 + $0x8] sm:$0xff]  }
  0x30   :  { %179 = vmatpush1.bf16.msra.mxu0 %v523_v6  ;;  %487 = vmatpush3.bf16.msra.mxu1 %v542_v15  ;;  %v548_v28 = vld [vmem:[#allocation8 + $0x18] sm:$0xff]   ;;  %v65_v29 = vpack.c.bf16 %v64_v27, %v63_v26  ;;  %v549_v30 = vld [vmem:[#allocation8 + $0x50] sm:$0xff]   ;;  %v553_v34 = vld [vmem:[#allocation8 + $0x40] sm:$0xff]   ;;  %p622_p4 = por %p621_p3, %p620_p2 }
  0x31   :  { %180 = vmatprep.subr.bf16.mxu0 %v524_v7  ;;  %488 = vmatprep.subr.bf16.mxu1 %v543_v16  ;;  %v550_v31 = vld [vmem:[#allocation8 + $0x10] sm:$0xff]   ;;  %v554_v35 = vld [vmem:[#allocation8] sm:$0xff]  }
  0x32   :  { %v82_v40 = vld [vmem:[%s709_s2] sm:$0x3]  ;;  %p623_p5 = pnand %p622_p4, %p616_p1 }
  0x33   :  { %v91_v42 = vrot.slane %v82_v40, %v90_v38  ;;  %v87_v43 = vrot.slane %v82_v40, %v86_v39  ;;  %v461_v58 = vld [vmem:[%s711_s4] ss:$0 sm:$0xff] }
  0x34   :  { %181 = vmatpush1.bf16.msra.mxu0 %v526_v8  ;;  %489 = vmatpush3.bf16.msra.mxu1 %v544_v19 }
  0x35   :  { %182 = vmatprep.subr.bf16.mxu0 %v527_v9  ;;  %490 = vmatprep.subr.bf16.mxu1 %v545_v20 }
  0x38   :  { %183 = vmatpush1.bf16.msra.mxu0 %v529_v11  ;;  %491 = vmatpush3.bf16.msra.mxu1 %v546_v22 }
  0x39   :  { %184 = vmatprep.subr.bf16.mxu0 %v530_v13  ;;  %492 = vmatprep.subr.bf16.mxu1 %v547_v24 }
  0x3c   :  { %185 = vmatpush1.bf16.msra.mxu0 %v532_v17  ;;  %493 = vmatpush3.bf16.msra.mxu1 %v548_v28 }
  0x3d   :  { %186 = vmatprep.subr.bf16.mxu0 %v533_v18  ;;  %494 = vmatprep.subr.bf16.mxu1 %v549_v30 }
  0x40   :  { %187 = vmatpush1.bf16.msra.mxu0 %v535_v21  ;;  %495 = vmatpush3.bf16.msra.mxu1 %v550_v31 }
  0x41   :  { %188 = vmatprep.subr.bf16.mxu0 %v536_v23  ;;  %496 = vmatprep.subr.bf16.mxu1 %v551_v32 }
  0x44   :  { %189 = vmatpush1.bf16.msra.mxu0 %v538_v25  ;;  %497 = vmatpush3.bf16.msra.mxu1 %v552_v33 }
  0x45   :  { %498 = vmatprep.subr.bf16.mxu1 %v553_v34 }
  0x47   :  { %207 = vmatmul.mubr.bf16.vlgmr.msra.gmra.mxu0 %v65_v29 }
  0x48   :  { %499 = vmatpush3.bf16.msra.mxu1 %v554_v35 }
 0x107   :  { %v208_v41 = vpop.f32.mrf.mxu0 }
 0x108   :  { %v209_v48 = vadd.f32 %v208_v41, %v87_v43 }
 0x109   :  { %v210_v44 = vpop.f32.mrf.mxu0 }
 0x10a   :  { %v211_v46 = vadd.f32 %v210_v44, %v91_v42  ;;  %v217_v54 = vmax.f32 %v209_v48, 0.0 }
 0x10b   :  { %v212_v45 = vpop.f32.mrf.mxu0 }
 0x10c   :  { %v213_v47 = vadd.f32 %v212_v45, %v87_v43  ;;  %v218_v52 = vmax.f32 %v211_v46, 0.0 }
 0x10d   :  { %v214_v49 = vpop.f32.mrf.mxu0 }
 0x10e   :  { %v215_v50 = vadd.f32 %v214_v49, %v91_v42  ;;  %v219_v51 = vmax.f32 %v213_v47, 0.0 }
 0x110   :  { %v220_v53 = vmax.f32 %v215_v50, 0.0  ;;  %v482_v56 = vpack.c.bf16 %v219_v51, %v217_v54 }
 0x112   :  { %v483_v55 = vpack.c.bf16 %v220_v53, %v218_v52 }
 0x114   :  { %414 = vmatprep.mubr.bf16.mxu1 %v483_v55 }
 0x115   :  { %415 = vmatmul.mubr.bf16.vlgmr.msra.gmra.mxu1 %v482_v56 }
 0x1d5   :  { %v500_v57 = vpop.f32.mrf.mxu1 }
 0x1d7   :  { %v501_v59 = vpop.f32.mrf.mxu1 }
 0x1d8   :  { %v502_v60 = vadd.f32 %v501_v59, %v500_v57 }
 0x1d9   :  { %v503_v61 = vpop.f32.mrf.mxu1 }
 0x1da   :  { %v417_v62 = vadd.f32 %v502_v60, %v461_v58 }
 0x1db   :  { %v504_v63 = vpop.f32.mrf.mxu1 }
 0x1dc   :  { %423 = vst [vmem:[#allocation9] sm:$0xff] %v417_v62  ;;  %v505_v0 = vadd.f32 %v504_v63, %v503_v61 }
 0x1de   :  { %v420_v1 = vadd.f32 %v505_v0, %v461_v58 }
 0x1e0   :  { %424 = vst [vmem:[#allocation9 + $0x8] sm:$0xff] %v420_v1 }
 0x1e1   :  { %626 = shalt.err (!%p623_p5)
}
 0x1e2   :  { %436 = dma.vmem_to_hbm [thread:$0]  %s431_s13, 256, %s712_s5, [#allocation5], %s643_s23, %s643_s23, %s644_s24  }
 0x1e3   :  { %639 = dma.done.wait [#allocation5], 256  }
 0x1e4   :  { %640 = vsyncadd [#allocation5], 4294967040 }
 0x1e5   :  { %440 = vsyncpa [#allocation4], 1 }
 0x1e6   :  { %441 = vsyncpa [#allocation7], 1 }
 0x1e7   :  { %442 = vsyncpa [#allocation5], 1 }

</bundles_post_ra>
